<compile_context>
chip_gen: v5e
topology: v5e:2x2
jax: 0.10.0
libtpu: 0.0.40
codegen_flags: <defaults>
</compile_context>

<pallas_src>
import functools
import itertools

import numpy as np
import jax
import jax.numpy as jnp
from jax.experimental import pallas as pl
from jax.experimental.pallas import tpu as pltpu

EPS = 1e-8          # torch.nn.CosineSimilarity default eps
TK_DEFAULT = 2048   # K-stream tile (lane-aligned); clamped to padded K


def _round_up(n, m):
    return (n + m - 1) // m * m


def _k_tiling(k_dim, tk):
    """Effective K tile and padded K used by both the weight prep and the call."""
    tk_eff = min(tk, _round_up(k_dim, 128))
    k_pad = _round_up(k_dim, tk_eff)
    return tk_eff, k_pad


def prepare_embedding_weight(w, *, tk=TK_DEFAULT):
    """One-time parameter prep: bf16 cast + zero-pad K to a tile multiple.

    Do this once at parameter-creation time (NOT per loss call) so the kernel
    streams 2 B/elem of W from HBM instead of re-casting f32 every call.
    """
    k_dim, _ = w.shape
    _, k_pad = _k_tiling(k_dim, tk)
    w_bf = w.astype(jnp.bfloat16)
    if k_pad != k_dim:
        w_bf = jnp.pad(w_bf, ((0, k_pad - k_dim), (0, 0)))
    return w_bf


def make_pair_matrix(batch_size, *, row_block=512):
    """NegativePairSelector -> 0/+1/-1 selection matrix S of shape (P_pad, B).

    v = S @ e gives e[pairs[:,0]] - e[pairs[:,1]] for every unordered pair.
    Rows are zero-padded to a multiple of the epilogue row block; padded rows
    contribute exactly 0 to both the MSE and (thanks to the eps clamp) the
    cosine sums.  Stored in bf16 (entries are exact in bf16).
    """
    if batch_size < 2:
        raise ValueError("TravelLoss needs batch_size >= 2 (otherwise 0 pairs).")
    pairs = np.asarray(list(itertools.combinations(range(batch_size), 2)))
    p = pairs.shape[0]
    rb = min(row_block, _round_up(p, 8))
    p_pad = _round_up(p, rb)
    s = np.zeros((p_pad, batch_size), np.float32)
    r = np.arange(p)
    s[r, pairs[:, 0]] = 1.0
    s[r, pairs[:, 1]] = -1.0
    return jnp.asarray(s, dtype=jnp.bfloat16), int(p), int(rb)


def _travel_loss_kernel(x_o_ref, x_t_ref, w_ref, s_ref, out_ref,
                        acc_o_ref, acc_t_ref, *,
                        k_dim, mask_tail, n_pairs, row_block):
    k = pl.program_id(0)

    @pl.when(k == 0)
    def _init():
        acc_o_ref[...] = jnp.zeros_like(acc_o_ref)
        acc_t_ref[...] = jnp.zeros_like(acc_t_ref)

    xo = x_o_ref[...]
    xt = x_t_ref[...]
    if mask_tail:
        # K is not a multiple of the tile: OOB block data is undefined, so
        # explicitly zero the tail columns before the matmul.
        tk = xo.shape[1]
        col = jax.lax.broadcasted_iota(jnp.int32, xo.shape, 1) + k * tk
        valid = col < k_dim
        xo = jnp.where(valid, xo, 0.0)
        xt = jnp.where(valid, xt, 0.0)

    # Per-tile bf16 cast; f32 accumulation in VMEM scratch.  Both domains
    # share the single streamed W tile (kernel is HBM-bound on W).
    w_tile = w_ref[...]
    acc_o_ref[...] += jnp.dot(xo.astype(jnp.bfloat16), w_tile,
                              preferred_element_type=jnp.float32)
    acc_t_ref[...] += jnp.dot(xt.astype(jnp.bfloat16), w_tile,
                              preferred_element_type=jnp.float32)

    @pl.when(k == pl.num_programs(0) - 1)
    def _epilogue():
        e_o = acc_o_ref[...]            # (B, D) f32 embeddings
        e_t = acc_t_ref[...]
        d = e_o.shape[1]
        p_pad = s_ref.shape[0]
        n_blk = p_pad // row_block

        # Blocked over pair rows: only scalar partial sums are carried, so
        # the (P_pad, D) travel matrix is never materialized (VMEM stays flat
        # at large B -- relevant for v7x's 64 MiB VMEM).
        mse_sum = jnp.float32(0.0)
        cos_sum = jnp.float32(0.0)
        for i in range(n_blk):
            s_blk = s_ref[i * row_block:(i + 1) * row_block, :].astype(jnp.float32)
            v_o = jnp.dot(s_blk, e_o, preferred_element_type=jnp.float32)
            v_t = jnp.dot(s_blk, e_t, preferred_element_type=jnp.float32)

            diff = v_o - v_t
            mse_sum = mse_sum + jnp.sum(diff * diff)

            dots = jnp.sum(v_o * v_t, axis=1, keepdims=True)
            n_o = jnp.sum(v_o * v_o, axis=1, keepdims=True)
            n_t = jnp.sum(v_t * v_t, axis=1, keepdims=True)
            # Per-factor rsqrt: no overflow of n_o * n_t; padded zero rows
            # give cos == 0.
            cos = (dots * jax.lax.rsqrt(jnp.maximum(n_o, EPS))) \
                * jax.lax.rsqrt(jnp.maximum(n_t, EPS))
            cos_sum = cos_sum + jnp.sum(cos)

        out_ref[0, 0] = (mse_sum * (1.0 / (n_pairs * d))
                         - cos_sum * (1.0 / n_pairs))


def travel_loss_pallas(x_o, x_t, w_prepared, *, tk=TK_DEFAULT):
    """TravelLoss with a linear embedding e = flatten(x) @ W.

    `w_prepared` must come from prepare_embedding_weight (bf16, K-padded).
    The bias of the linear embedding cancels exactly in the pairwise
    differences, so it never enters the kernel.
    """
    batch = x_o.shape[0]
    if batch < 2:
        raise ValueError("TravelLoss needs batch_size >= 2.")
    xo = x_o.reshape(batch, -1)
    xt = x_t.reshape(batch, -1)
    k_dim = xo.shape[1]
    d = w_prepared.shape[1]

    tk_eff, k_pad = _k_tiling(k_dim, tk)
    if w_prepared.shape[0] != k_pad or w_prepared.dtype != jnp.bfloat16:
        raise ValueError("w_prepared must be prepare_embedding_weight(w, tk=tk)")
    n_k = k_pad // tk_eff
    mask_tail = (k_pad != k_dim)

    s_mat, n_pairs, rb = make_pair_matrix(batch)
    p_pad = s_mat.shape[0]

    # VMEM budget: double-buffered x/W/S streams + accumulators + blocked
    # epilogue temporaries.  Explicit limit so v5e (16 MiB scoped default)
    # accepts large tiles; capped at 64 MiB (v7x physical per-TC VMEM).
    vmem_bytes = (2 * 2 * batch * tk_eff * 4     # x_o + x_t tiles (f32, x2 buf)
                  + 2 * tk_eff * d * 2           # W tile (bf16, x2 buf)
                  + 2 * p_pad * batch * 2        # S (bf16, x2 buf)
                  + 2 * batch * d * 4            # accumulators
                  + 4 * rb * d * 4)              # epilogue block temporaries
    vmem_limit = int(min(max(2 * vmem_bytes + (8 << 20), 32 << 20), 64 << 20))

    flops = int(2 * (2 * batch) * k_pad * d + 2 * 2 * p_pad * batch * d)
    bytes_accessed = int(2 * batch * k_dim * 4 + k_pad * d * 2
                         + p_pad * batch * 2 + 4)

    kernel = functools.partial(_travel_loss_kernel,
                               k_dim=k_dim, mask_tail=mask_tail,
                               n_pairs=n_pairs, row_block=rb)

    out = pl.pallas_call(
        kernel,
        out_shape=jax.ShapeDtypeStruct((1, 1), jnp.float32),
        grid=(n_k,),
        in_specs=[
            pl.BlockSpec((batch, tk_eff), lambda k: (0, k)),   # x_o K-stream
            pl.BlockSpec((batch, tk_eff), lambda k: (0, k)),   # x_t K-stream
            pl.BlockSpec((tk_eff, d), lambda k: (k, 0)),       # W K-stream (bf16)
            pl.BlockSpec((p_pad, batch), lambda k: (0, 0)),    # tiny pair matrix
        ],
        out_specs=pl.BlockSpec(memory_space=pltpu.MemorySpace.SMEM),
        scratch_shapes=[pltpu.VMEM((batch, d), jnp.float32),
                        pltpu.VMEM((batch, d), jnp.float32)],
        compiler_params=pltpu.CompilerParams(
            dimension_semantics=("arbitrary",),
            vmem_limit_bytes=vmem_limit),
        cost_estimate=pl.CostEstimate(flops=flops, transcendentals=0,
                                      bytes_accessed=bytes_accessed),
    )(xo, xt, w_prepared, s_mat)
    return out[0, 0]


def travel_loss_ref(x_o, x_t, w, b):
    """Pure-JAX mirror of the PyTorch forward (linear embedding WITH bias;
    the bias cancels in the loss).  Uses the same bf16 operands / f32
    accumulation fidelity choice as the kernel."""
    batch = x_o.shape[0]
    pairs = np.asarray(list(itertools.combinations(range(batch), 2)))
    xo = x_o.reshape(batch, -1).astype(jnp.bfloat16)
    xt = x_t.reshape(batch, -1).astype(jnp.bfloat16)
    w_bf = w.astype(jnp.bfloat16)
    e_o = jnp.dot(xo, w_bf, preferred_element_type=jnp.float32) + b
    e_t = jnp.dot(xt, w_bf, preferred_element_type=jnp.float32) + b
    v_o = e_o[pairs[:, 0]] - e_o[pairs[:, 1]]
    v_t = e_t[pairs[:, 0]] - e_t[pairs[:, 1]]
    mse = jnp.mean((v_o - v_t) ** 2)
    cos = jnp.sum(v_o * v_t, axis=1) / jnp.maximum(
        jnp.linalg.norm(v_o, axis=1) * jnp.linalg.norm(v_t, axis=1), EPS)
    return mse - jnp.mean(cos)


if __name__ == "__main__":
    # Small shapes consistent with the module: batch=4 (-> 6 pairs), NCHW.
    B, C, H, W = 4, 4, 16, 16
    D_EMB = 32
    K = C * H * W

    key = jax.random.PRNGKey(0)
    k_xo, k_xt, k_w, k_b = jax.random.split(key, 4)
    x_o = jax.random.normal(k_xo, (B, C, H, W), jnp.float32)
    x_t = jax.random.normal(k_xt, (B, C, H, W), jnp.float32)

    # Deterministic linear embedding parameters.  The bias is non-zero in the
    # reference to demonstrate that it cancels in the pairwise differences.
    w = jax.random.normal(k_w, (K, D_EMB), jnp.float32) / np.sqrt(K)
    b = jax.random.normal(k_b, (1, D_EMB), jnp.float32)

    # One-time parameter prep (bf16 + K-pad) -- outside the per-call path.
    w_prep = prepare_embedding_weight(w, tk=TK_DEFAULT)

    loss = travel_loss_pallas(x_o, x_t, w_prep, tk=TK_DEFAULT)
    loss = jax.block_until_ready(loss)

    ref = travel_loss_ref(x_o, x_t, w, b)
    np.testing.assert_allclose(np.asarray(loss), np.asarray(ref),
                               rtol=1e-3, atol=1e-3)

    print("KERNEL_OK")
</pallas_src>

<mosaic_0001>
module attributes {stable_mosaic.version = 11 : i64} {
  func.func @_travel_loss_kernel(%arg0: i32, %arg1: memref<4x1024xf32, #tpu.memory_space<vmem>>, %arg2: memref<4x1024xf32, #tpu.memory_space<vmem>>, %arg3: memref<1024x32xbf16, #tpu.memory_space<vmem>>, %arg4: memref<8x4xbf16, #tpu.memory_space<vmem>>, %arg5: memref<1x1xf32, #tpu.memory_space<smem>>, %arg6: memref<4x32xf32, #tpu.memory_space<vmem>>, %arg7: memref<4x32xf32, #tpu.memory_space<vmem>>) attributes {dimension_semantics = [#tpu.dimension_semantics<arbitrary>], iteration_bounds = array<i64: 1>, scalar_prefetch = 0 : i64, scratch_operands = 2 : i64, tpu.core_type = #tpu.core_type<tc>, window_params = [{transform_indices = @transform_0, window_bounds = array<i64: 4, 1024>}, {transform_indices = @transform_1, window_bounds = array<i64: 4, 1024>}, {transform_indices = @transform_2, window_bounds = array<i64: 1024, 32>}, {pipeline_mode = #tpu.pipeline_mode<synchronous>, transform_indices = @transform_3, window_bounds = array<i64: 8, 4>}, {transform_indices = @transform_4, window_bounds = array<i64: 1, 1>}]} {
    %c0_i32 = arith.constant 0 : i32
    %0 = arith.cmpi eq, %arg0, %c0_i32 : i32
    %1 = arith.extui %0 : i1 to i32
    %c0_i32_0 = arith.constant 0 : i32
    %2 = arith.cmpi ne, %1, %c0_i32_0 : i32
    scf.if %2 {
      %cst_17 = arith.constant 0.000000e+00 : f32
      %19 = vector.broadcast %cst_17 : f32 to vector<4x32xf32>
      %c0_18 = arith.constant 0 : index
      %c0_19 = arith.constant 0 : index
      %20 = vector.load %arg6[%c0_18, %c0_19] : memref<4x32xf32, #tpu.memory_space<vmem>>, vector<4x32xf32>
      tpu.vector_store %arg6[%c0_18, %c0_19], %19 {strides = array<i32>} : memref<4x32xf32, #tpu.memory_space<vmem>>, vector<4x32xf32>,
      %cst_20 = arith.constant 0.000000e+00 : f32
      %21 = vector.broadcast %cst_20 : f32 to vector<4x32xf32>
      %c0_21 = arith.constant 0 : index
      %c0_22 = arith.constant 0 : index
      %22 = vector.load %arg7[%c0_21, %c0_22] : memref<4x32xf32, #tpu.memory_space<vmem>>, vector<4x32xf32>
      tpu.vector_store %arg7[%c0_21, %c0_22], %21 {strides = array<i32>} : memref<4x32xf32, #tpu.memory_space<vmem>>, vector<4x32xf32>,
    } else {
    }
    %c0 = arith.constant 0 : index
    %c0_1 = arith.constant 0 : index
    %3 = vector.load %arg1[%c0, %c0_1] : memref<4x1024xf32, #tpu.memory_space<vmem>>, vector<4x1024xf32>
    %c0_2 = arith.constant 0 : index
    %c0_3 = arith.constant 0 : index
    %4 = vector.load %arg2[%c0_2, %c0_3] : memref<4x1024xf32, #tpu.memory_space<vmem>>, vector<4x1024xf32>
    %c0_4 = arith.constant 0 : index
    %c0_5 = arith.constant 0 : index
    %5 = vector.load %arg3[%c0_4, %c0_5] : memref<1024x32xbf16, #tpu.memory_space<vmem>>, vector<1024x32xbf16>
    %c0_6 = arith.constant 0 : index
    %c0_7 = arith.constant 0 : index
    %6 = vector.load %arg6[%c0_6, %c0_7] : memref<4x32xf32, #tpu.memory_space<vmem>>, vector<4x32xf32>
    %7 = arith.truncf %3 : vector<4x1024xf32> to vector<4x1024xbf16>
    %cst = arith.constant dense<0.000000e+00> : vector<4x32xf32>
    %8 = tpu.matmul %7, %5, %cst {dimension_numbers = #tpu.dot_dimension_numbers<[1], [0], [0], [1], [0, 0, 1, 1], [], []>} : vector<4x1024xbf16>, vector<1024x32xbf16>, vector<4x32xf32> -> vector<4x32xf32>
    %9 = arith.addf %6, %8 : vector<4x32xf32>
    %c0_8 = arith.constant 0 : index
    %c0_9 = arith.constant 0 : index
    %10 = vector.load %arg6[%c0_8, %c0_9] : memref<4x32xf32, #tpu.memory_space<vmem>>, vector<4x32xf32>
    tpu.vector_store %arg6[%c0_8, %c0_9], %9 {strides = array<i32>} : memref<4x32xf32, #tpu.memory_space<vmem>>, vector<4x32xf32>,
    %c0_10 = arith.constant 0 : index
    %c0_11 = arith.constant 0 : index
    %11 = vector.load %arg7[%c0_10, %c0_11] : memref<4x32xf32, #tpu.memory_space<vmem>>, vector<4x32xf32>
    %12 = arith.truncf %4 : vector<4x1024xf32> to vector<4x1024xbf16>
    %cst_12 = arith.constant dense<0.000000e+00> : vector<4x32xf32>
    %13 = tpu.matmul %12, %5, %cst_12 {dimension_numbers = #tpu.dot_dimension_numbers<[1], [0], [0], [1], [0, 0, 1, 1], [], []>} : vector<4x1024xbf16>, vector<1024x32xbf16>, vector<4x32xf32> -> vector<4x32xf32>
    %14 = arith.addf %11, %13 : vector<4x32xf32>
    %c0_13 = arith.constant 0 : index
    %c0_14 = arith.constant 0 : index
    %15 = vector.load %arg7[%c0_13, %c0_14] : memref<4x32xf32, #tpu.memory_space<vmem>>, vector<4x32xf32>
    tpu.vector_store %arg7[%c0_13, %c0_14], %14 {strides = array<i32>} : memref<4x32xf32, #tpu.memory_space<vmem>>, vector<4x32xf32>,
    %c0_i32_15 = arith.constant 0 : i32
    %16 = arith.cmpi eq, %arg0, %c0_i32_15 : i32
    %17 = arith.extui %16 : i1 to i32
    %c0_i32_16 = arith.constant 0 : i32
    %18 = arith.cmpi ne, %17, %c0_i32_16 : i32
    scf.if %18 {
      %c0_17 = arith.constant 0 : index
      %c0_18 = arith.constant 0 : index
      %19 = vector.load %arg6[%c0_17, %c0_18] : memref<4x32xf32, #tpu.memory_space<vmem>>, vector<4x32xf32>
      %c0_19 = arith.constant 0 : index
      %c0_20 = arith.constant 0 : index
      %20 = vector.load %arg7[%c0_19, %c0_20] : memref<4x32xf32, #tpu.memory_space<vmem>>, vector<4x32xf32>
      %c0_21 = arith.constant 0 : index
      %c0_22 = arith.constant 0 : index
      %21 = vector.load %arg4[%c0_21, %c0_22] : memref<8x4xbf16, #tpu.memory_space<vmem>>, vector<8x4xbf16>
      %22 = arith.extf %21 : vector<8x4xbf16> to vector<8x4xf32>
      %cst_23 = arith.constant dense<0.000000e+00> : vector<8x32xf32>
      %23 = tpu.matmul %22, %19, %cst_23 {dimension_numbers = #tpu.dot_dimension_numbers<[1], [0], [0], [1], [0, 0, 1, 1], [], []>} : vector<8x4xf32>, vector<4x32xf32>, vector<8x32xf32> -> vector<8x32xf32>
      %cst_24 = arith.constant dense<0.000000e+00> : vector<8x32xf32>
      %24 = tpu.matmul %22, %20, %cst_24 {dimension_numbers = #tpu.dot_dimension_numbers<[1], [0], [0], [1], [0, 0, 1, 1], [], []>} : vector<8x4xf32>, vector<4x32xf32>, vector<8x32xf32> -> vector<8x32xf32>
      %25 = arith.subf %23, %24 : vector<8x32xf32>
      %26 = arith.mulf %25, %25 : vector<8x32xf32>
      %27 = vector.shape_cast %26 : vector<8x32xf32> to vector<1x8x32xf32>
      %cst_25 = arith.constant dense<0.000000e+00> : vector<1xf32>
      %28 = vector.multi_reduction <add>, %27, %cst_25 [1, 2] : vector<1x8x32xf32> to vector<1xf32>
      %29 = vector.shape_cast %28 : vector<1xf32> to vector<1x1x1xf32>
      %30 = vector.extract %29[0, 0, 0] : f32 from vector<1x1x1xf32>
      %cst_26 = arith.constant 0.000000e+00 : f32
      %31 = arith.addf %cst_26, %30 : f32
      %32 = arith.mulf %23, %24 : vector<8x32xf32>
      %cst_27 = arith.constant dense<0.000000e+00> : vector<8xf32>
      %33 = vector.multi_reduction <add>, %32, %cst_27 [1] : vector<8x32xf32> to vector<8xf32>
      %34 = vector.shape_cast %33 : vector<8xf32> to vector<8x1xf32>
      %35 = arith.mulf %23, %23 : vector<8x32xf32>
      %cst_28 = arith.constant dense<0.000000e+00> : vector<8xf32>
      %36 = vector.multi_reduction <add>, %35, %cst_28 [1] : vector<8x32xf32> to vector<8xf32>
      %37 = vector.shape_cast %36 : vector<8xf32> to vector<8x1xf32>
      %38 = arith.mulf %24, %24 : vector<8x32xf32>
      %cst_29 = arith.constant dense<0.000000e+00> : vector<8xf32>
      %39 = vector.multi_reduction <add>, %38, %cst_29 [1] : vector<8x32xf32> to vector<8xf32>
      %40 = vector.shape_cast %39 : vector<8xf32> to vector<8x1xf32>
      %cst_30 = arith.constant 9.99999993E-9 : f32
      %41 = vector.broadcast %cst_30 : f32 to vector<8x1xf32>
      %42 = arith.maximumf %37, %41 : vector<8x1xf32>
      %43 = math.rsqrt %42 : vector<8x1xf32>
      %44 = arith.mulf %34, %43 : vector<8x1xf32>
      %cst_31 = arith.constant 9.99999993E-9 : f32
      %45 = vector.broadcast %cst_31 : f32 to vector<8x1xf32>
      %46 = arith.maximumf %40, %45 : vector<8x1xf32>
      %47 = math.rsqrt %46 : vector<8x1xf32>
      %48 = arith.mulf %44, %47 : vector<8x1xf32>
      %49 = vector.shape_cast %48 : vector<8x1xf32> to vector<1x8x1xf32>
      %cst_32 = arith.constant dense<0.000000e+00> : vector<1xf32>
      %50 = vector.multi_reduction <add>, %49, %cst_32 [1, 2] : vector<1x8x1xf32> to vector<1xf32>
      %51 = vector.shape_cast %50 : vector<1xf32> to vector<1x1x1xf32>
      %52 = vector.extract %51[0, 0, 0] : f32 from vector<1x1x1xf32>
      %cst_33 = arith.constant 0.000000e+00 : f32
      %53 = arith.addf %cst_33, %52 : f32
      %cst_34 = arith.constant 0.00520833349 : f32
      %54 = arith.mulf %31, %cst_34 : f32
      %cst_35 = arith.constant 0.166666672 : f32
      %55 = arith.mulf %53, %cst_35 : f32
      %56 = arith.subf %54, %55 : f32
      %c0_36 = arith.constant 0 : index
      %c0_37 = arith.constant 0 : index
      %57 = memref.load %arg5[%c0_36, %c0_37] : memref<1x1xf32, #tpu.memory_space<smem>>
      memref.store %56, %arg5[%c0_36, %c0_37] : memref<1x1xf32, #tpu.memory_space<smem>>
    } else {
    }
    return
  }
  func.func @transform_0(%arg0: i32) -> (i32, i32) {
    %c0_i32 = arith.constant 0 : i32
    %c0_i32_0 = arith.constant 0 : i32
    return %c0_i32, %arg0 : i32, i32
  }
  func.func @transform_1(%arg0: i32) -> (i32, i32) {
    %c0_i32 = arith.constant 0 : i32
    %c0_i32_0 = arith.constant 0 : i32
    return %c0_i32, %arg0 : i32, i32
  }
  func.func @transform_2(%arg0: i32) -> (i32, i32) {
    %c0_i32 = arith.constant 0 : i32
    %c0_i32_0 = arith.constant 0 : i32
    return %arg0, %c0_i32 : i32, i32
  }
  func.func @transform_3(%arg0: i32) -> (i32, i32) {
    %c0_i32 = arith.constant 0 : i32
    %c0_i32_0 = arith.constant 0 : i32
    %c0_i32_1 = arith.constant 0 : i32
    return %c0_i32, %c0_i32_0 : i32, i32
  }
  func.func @transform_4(%arg0: i32) -> (i32, i32) {
    %c0_i32 = arith.constant 0 : i32
    %c0_i32_0 = arith.constant 0 : i32
    %c0_i32_1 = arith.constant 0 : i32
    return %c0_i32, %c0_i32_0 : i32, i32
  }
}

</mosaic_0001>

<bundles_post_ra>
// kernel: tpu_custom_call.1
= control target key start
LH: loop header
LB: loop body
LE: loop exit
PB: predicated region body
PF: predicated region fallthrough
CT: control target
= control target key end

     0   :  { %s1839_s0 = inlined_call_operand.vmem [shape: f32[4,1024], index: 0, kind: input, shape index: {}]   ;;  %s1840_s1 = inlined_call_operand.vmem [shape: f32[4,1024], index: 1, kind: input, shape index: {}]   ;;  %s1841_s2 = inlined_call_operand.vmem [shape: bf16[1024,32], index: 2, kind: input, shape index: {}]   ;;  %s1842_s3 = inlined_call_operand.vmem [shape: bf16[8,4], index: 3, kind: input, shape index: {}]   ;;  %s1843_s4 = inlined_call_operand.hbm [shape: f32[1,1], index: 4, kind: output, shape index: {}]  }
   0x1   :  { %v1348_v0 = vld [vmem:[%s1841_s2 + $0x38] sm:$0xff]  ;;  %v1370_v4 = vld [vmem:[%s1841_s2 + $0x30] sm:$0xff]  ;;  %v1394_v8 = vld [vmem:[%s1841_s2 + $0x28] sm:$0xff] }
   0x2   :  { %v1353_v1 = vld [vmem:[%s1841_s2 + $0x78] sm:$0xff]  ;;  %581 = vmatpush.bf16.msra.mxu0 %v1348_v0  ;;  %v1375_v5 = vld [vmem:[%s1841_s2 + $0x70] sm:$0xff]  ;;  %v1399_v9 = vld [vmem:[%s1841_s2 + $0x68] sm:$0xff] }
   0x3   :  { %v1358_v2 = vld [vmem:[%s1841_s2 + $0xb8] sm:$0xff]  ;;  %594 = vmatpush.bf16.msra.mxu1 %v1353_v1  ;;  %v1382_v6 = vld [vmem:[%s1841_s2 + $0xb0] sm:$0xff]  ;;  %v1406_v10 = vld [vmem:[%s1841_s2 + $0xa8] sm:$0xff] }
   0x4   :  { %v1363_v3 = vld [vmem:[%s1841_s2 + $0xf8] sm:$0xff]  ;;  %607 = vmatpush.bf16.msra.mxu2 %v1358_v2  ;;  %v1387_v7 = vld [vmem:[%s1841_s2 + $0xf0] sm:$0xff]  ;;  %v1411_v11 = vld [vmem:[%s1841_s2 + $0xe8] sm:$0xff] }
   0x5   :  { %620 = vmatpush.bf16.msra.mxu3 %v1363_v3  ;;  %v1418_v12 = vld [vmem:[%s1841_s2 + $0x20] sm:$0xff]  ;;  %v1442_v16 = vld [vmem:[%s1841_s2 + $0x18] sm:$0xff]  ;;  %v1464_v20 = vld [vmem:[%s1841_s2 + $0x10] sm:$0xff] }
   0x6   :  { %582 = vmatpush.bf16.msra.mxu0 %v1370_v4  ;;  %v1423_v13 = vld [vmem:[%s1841_s2 + $0x60] sm:$0xff]  ;;  %v1447_v17 = vld [vmem:[%s1841_s2 + $0x58] sm:$0xff]  ;;  %v26_v21 = vld [vmem:[%s1839_s0 + $0x8] sm:$0xff] }
   0x7   :  { %595 = vmatpush.bf16.msra.mxu1 %v1375_v5  ;;  %v1430_v14 = vld [vmem:[%s1841_s2 + $0xa0] sm:$0xff]  ;;  %v1454_v18 = vld [vmem:[%s1841_s2 + $0x98] sm:$0xff]  ;;  %v1474_v22 = vld [vmem:[%s1841_s2 + $0x50] sm:$0xff]  ;;  %168 = vst [vmem:[#allocation1 + $0x10] ss:$2 sm:$0xff] %v26_v21 }
   0x8   :  { %608 = vmatpush.bf16.msra.mxu2 %v1382_v6  ;;  %v1435_v15 = vld [vmem:[%s1841_s2 + $0xe0] sm:$0xff]  ;;  %v1459_v19 = vld [vmem:[%s1841_s2 + $0xd8] sm:$0xff] }
   0x9   :  { %621 = vmatpush.bf16.msra.mxu3 %v1387_v7  ;;  %v25_v23 = vld [vmem:[%s1839_s0] sm:$0xff] }
   0xa   :  { %583 = vmatpush.bf16.msra.mxu0 %v1394_v8 }
   0xb   :  { %596 = vmatpush.bf16.msra.mxu1 %v1399_v9 }
   0xc   :  { %609 = vmatpush.bf16.msra.mxu2 %v1406_v10 }
   0xd   :  { %622 = vmatpush.bf16.msra.mxu3 %v1411_v11 }
   0xe   :  { %584 = vmatpush.bf16.msra.mxu0 %v1418_v12 }
   0xf   :  { %597 = vmatpush.bf16.msra.mxu1 %v1423_v13 }
  0x10   :  { %610 = vmatpush.bf16.msra.mxu2 %v1430_v14 }
  0x11   :  { %623 = vmatpush.bf16.msra.mxu3 %v1435_v15 }
  0x12   :  { %585 = vmatpush.bf16.msra.mxu0 %v1442_v16 }
  0x13   :  { %598 = vmatpush.bf16.msra.mxu1 %v1447_v17 }
  0x14   :  { %9 = vsyncpa [#allocation5], 0  ;;  %611 = vmatpush.bf16.msra.mxu2 %v1454_v18  ;;  %v1484_v24 = vld [vmem:[%s1841_s2 + $0x90] sm:$0xff]  ;;  %166 = vst [vmem:[#allocation1] ss:$2 sm:$0xff] %v25_v23  ;;  %v1496_v26 = vld [vmem:[%s1841_s2 + $0x8] sm:$0xff] }
  0x15   :  { %624 = vmatpush.bf16.msra.mxu3 %v1459_v19  ;;  %v1489_v25 = vld [vmem:[%s1841_s2 + $0xd0] sm:$0xff]  ;;  %v1501_v27 = vld [vmem:[%s1841_s2 + $0x48] sm:$0xff]  ;;  %v1521_v31 = vld [vmem:[%s1841_s2] sm:$0xff]  ;;  %vm22_vm0 = vcmask 257024   ;;  %vm841_vm1 = vcmask 1043456   ;;  %vm837_vm2 = vcmask 31744  }
  0x16   :  { %586 = vmatpush.bf16.msra.mxu0 %v1464_v20  ;;  %v1508_v28 = vld [vmem:[%s1841_s2 + $0x88] sm:$0xff]  ;;  %v1526_v32 = vld [vmem:[%s1841_s2 + $0x40] sm:$0xff]  ;;  %v175_v34 = vld.sshfl [vmem:[#allocation1 + $0x10] sm:$0xff pattern:$0x75316420]  ;;  %vm890_vm3 = vcmask 261120  }
  0x17   :  { %599 = vmatpush.bf16.msra.mxu1 %v1474_v22  ;;  %v1513_v29 = vld [vmem:[%s1841_s2 + $0xc8] sm:$0xff]  ;;  %v29_v33 = vld [vmem:[%s1840_s1] sm:$0xff]  ;;  %v176_v35 = vld.sshfl [vmem:[#allocation1 + $0x18] sm:$0xff pattern:$0x75316420]  ;;  %v191_v46 = vpack.c.bf16 %v175_v34, %v175_v34  ;;  %vm938_vm10 = vcmask 7168  }
  0x18   :  { %612 = vmatpush.bf16.msra.mxu2 %v1484_v24  ;;  %v30_v30 = vld [vmem:[%s1840_s1 + $0x8] sm:$0xff]  ;;  %v1536_v36 = vld [vmem:[%s1841_s2 + $0x80] sm:$0xff]  ;;  %v1546_v38 = vld [vmem:[%s1841_s2 + $0x138] sm:$0xff]  ;;  %v192_v48 = vpack.c.bf16 %v176_v35, %v176_v35  ;;  %s960_s27 = sshll.u32 %s1843_s4, 4  ;;  %s1319_s6 = smov [#allocation4]   ;;  %s961_s27 = int_to_ptr.hbm [resolvable:$true] %s960_s27 }
  0x19   :  { %625 = vmatpush.bf16.msra.mxu3 %v1489_v25  ;;  %v1541_v37 = vld [vmem:[%s1841_s2 + $0xc0] sm:$0xff]  ;;  %695 = vst [vmem:[#allocation1 + $0x10] ss:$2 sm:$0xff] %v30_v30  ;;  %v1553_v41 = vld [vmem:[%s1841_s2 + $0x178] sm:$0xff]  ;;  %v27_v43 = vld [vmem:[%s1839_s0 + $0x10] sm:$0xff] }
  0x1a   :  { %587 = vmatpush.bf16.msra.mxu0 %v1496_v26  ;;  %v28_v42 = vld [vmem:[%s1839_s0 + $0x18] sm:$0xff]  ;;  %170 = vst [vmem:[#allocation1 + $0x20] ss:$2 sm:$0xff] %v27_v43  ;;  %v1580_v50 = vld [vmem:[%s1841_s2 + $0x130] sm:$0xff]  ;;  %v1602_v54 = vld [vmem:[%s1841_s2 + $0x128] sm:$0xff] }
  0x1b   :  { %600 = vmatpush.bf16.msra.mxu1 %v1501_v27  ;;  %v173_v39 = vld.sshfl [vmem:[#allocation1] sm:$0xff pattern:$0x75316420]  ;;  %v174_v40 = vld.sshfl [vmem:[#allocation1 + $0x8] sm:$0xff pattern:$0x75316420] }
  0x1c   :  { %613 = vmatpush.bf16.msra.mxu2 %v1508_v28  ;;  %693 = vst [vmem:[#allocation1] ss:$2 sm:$0xff] %v29_v33  ;;  %v1564_v44 = vld [vmem:[%s1841_s2 + $0x1b8] sm:$0xff]  ;;  %v189_v47 = vpack.c.bf16 %v173_v39, %v173_v39  ;;  %v190_v49 = vpack.c.bf16 %v174_v40, %v174_v40  ;;  %v1585_v51 = vld [vmem:[%s1841_s2 + $0x170] sm:$0xff]  ;;  %v1607_v55 = vld [vmem:[%s1841_s2 + $0x168] sm:$0xff] }
  0x1d   :  { %626 = vmatpush.bf16.msra.mxu3 %v1513_v29  ;;  %v1569_v45 = vld [vmem:[%s1841_s2 + $0x1f8] sm:$0xff]  ;;  %172 = vst [vmem:[#allocation1 + $0x30] ss:$2 sm:$0xff] %v28_v42  ;;  %v1592_v52 = vld [vmem:[%s1841_s2 + $0x1b0] sm:$0xff]  ;;  %v1623_v59 = vld [vmem:[%s1841_s2 + $0x1a8] sm:$0xff] }
  0x1e   :  { %588 = vmatpush.bf16.msra.mxu0 %v1521_v31  ;;  %v1597_v53 = vld [vmem:[%s1841_s2 + $0x1f0] sm:$0xff]  ;;  %v32_v56 = vld [vmem:[%s1840_s1 + $0x18] sm:$0xff]  ;;  %v1628_v60 = vld [vmem:[%s1841_s2 + $0x1e8] sm:$0xff] }
  0x1f   :  { %601 = vmatpush.bf16.msra.mxu1 %v1526_v32  ;;  %v31_v62 = vld [vmem:[%s1840_s1 + $0x10] sm:$0xff]  ;;  %v1638_v21 = vld [vmem:[%s1841_s2 + $0x120] sm:$0xff]  ;;  %v1662_v34 = vld [vmem:[%s1841_s2 + $0x118] sm:$0xff] }
  0x20   :  { %614 = vmatpush.bf16.msra.mxu2 %v1536_v36  ;;  %v1643_v23 = vld [vmem:[%s1841_s2 + $0x160] sm:$0xff]  ;;  %v1667_v35 = vld [vmem:[%s1841_s2 + $0x158] sm:$0xff]  ;;  %v1686_v42 = vld [vmem:[%s1841_s2 + $0x110] sm:$0xff] }
  0x21   :  { %627 = vmatpush.bf16.msra.mxu3 %v1541_v37  ;;  %589 = vmatmul.bf16.vlgmr.msra.gmra.mxu0 %v189_v47  ;;  %v177_v61 = vld.sshfl [vmem:[#allocation1 + $0x20] sm:$0xff pattern:$0x75316420]  ;;  %v178_v63 = vld.sshfl [vmem:[#allocation1 + $0x28] sm:$0xff pattern:$0x75316420] }
  0x22   :  { %633 = vmatpush.bf16.msrb.mxu0 %v1546_v38  ;;  %602 = vmatmul.bf16.vlgmr.msra.gmra.mxu1 %v190_v49  ;;  %697 = vst [vmem:[#allocation1 + $0x20] ss:$2 sm:$0xff] %v31_v62  ;;  %v1650_v30 = vld [vmem:[%s1841_s2 + $0x1a0] sm:$0xff]  ;;  %v1674_v39 = vld [vmem:[%s1841_s2 + $0x198] sm:$0xff]  ;;  %v1691_v43 = vld [vmem:[%s1841_s2 + $0x150] sm:$0xff] }
  0x23   :  { %646 = vmatpush.bf16.msrb.mxu1 %v1553_v41  ;;  %615 = vmatmul.bf16.vlgmr.msra.gmra.mxu2 %v191_v46  ;;  %v1655_v33 = vld [vmem:[%s1841_s2 + $0x1e0] sm:$0xff]  ;;  %v1679_v40 = vld [vmem:[%s1841_s2 + $0x1d8] sm:$0xff]  ;;  %1852 = vst [vmem:[#allocation7_spill] sm:$0xff] %v1686_v42  ;;  %v1698_v46 = vld [vmem:[%s1841_s2 + $0x190] sm:$0xff] }
  0x24   :  { %659 = vmatpush.bf16.msrb.mxu2 %v1564_v44  ;;  %628 = vmatmul.bf16.vlgmr.msra.gmra.mxu3 %v192_v48  ;;  %v1614_v57 = vld.sshfl [vmem:[#allocation1 + $0x30] sm:$0xff pattern:$0x75316420]  ;;  %v1616_v58 = vld.sshfl [vmem:[#allocation1 + $0x38] sm:$0xff pattern:$0x75316420] }
  0x25   :  { %672 = vmatpush.bf16.msrb.mxu3 %v1569_v45  ;;  %699 = vst [vmem:[#allocation1 + $0x30] ss:$2 sm:$0xff] %v32_v56  ;;  %v1703_v47 = vld [vmem:[%s1841_s2 + $0x1d0] sm:$0xff]  ;;  %v1710_v48 = vld [vmem:[%s1841_s2 + $0x108] sm:$0xff] }
  0x26   :  { %634 = vmatpush.bf16.msrb.mxu0 %v1580_v50  ;;  %1853 = vst [vmem:[#allocation8_spill] sm:$0xff] %v1691_v43  ;;  %v1715_v49 = vld [vmem:[%s1841_s2 + $0x148] sm:$0xff] }
  0x27   :  { %647 = vmatpush.bf16.msrb.mxu1 %v1585_v51  ;;  %1854 = vst [vmem:[#allocation9_spill] sm:$0xff] %v1698_v46  ;;  %v1722_v56 = vld [vmem:[%s1841_s2 + $0x188] sm:$0xff] }
  0x28   :  { %660 = vmatpush.bf16.msrb.mxu2 %v1592_v52  ;;  %1855 = vst [vmem:[#allocation10_spill] sm:$0xff] %v1703_v47  ;;  %v1727_v62 = vld [vmem:[%s1841_s2 + $0x1c8] sm:$0xff] }
  0x29   :  { %673 = vmatpush.bf16.msrb.mxu3 %v1597_v53  ;;  %1856 = vst [vmem:[#allocation11_spill] sm:$0xff] %v1710_v48 }
  0x2a   :  { %635 = vmatpush.bf16.msrb.mxu0 %v1602_v54  ;;  %1857 = vst [vmem:[#allocation12_spill] sm:$0xff] %v1715_v49 }
  0x2b   :  { %648 = vmatpush.bf16.msrb.mxu1 %v1607_v55  ;;  %1858 = vst [vmem:[#allocation13_spill] sm:$0xff] %v1722_v56 }
  0x2c   :  { %661 = vmatpush.bf16.msrb.mxu2 %v1623_v59  ;;  %1859 = vst [vmem:[#allocation14_spill] sm:$0xff] %v1727_v62 }
  0x2d   :  { %674 = vmatpush.bf16.msrb.mxu3 %v1628_v60 }
  0x2e   :  { %636 = vmatpush.bf16.msrb.mxu0 %v1638_v21 }
  0x2f   :  { %649 = vmatpush.bf16.msrb.mxu1 %v1643_v23 }
  0x30   :  { %662 = vmatpush.bf16.msrb.mxu2 %v1650_v30 }
  0x31   :  { %675 = vmatpush.bf16.msrb.mxu3 %v1655_v33 }
  0x32   :  { %637 = vmatpush.bf16.msrb.mxu0 %v1662_v34 }
  0x33   :  { %650 = vmatpush.bf16.msrb.mxu1 %v1667_v35 }
  0x34   :  { %663 = vmatpush.bf16.msrb.mxu2 %v1674_v39 }
  0x35   :  { %676 = vmatpush.bf16.msrb.mxu3 %v1679_v40 }
  0x36   :  { %638 = vmatpush.bf16.msrb.mxu0 %v1686_v42  ;;  %v194_v42 = vpack.c.bf16 %v178_v63, %v178_v63 }
  0x37   :  { %651 = vmatpush.bf16.msrb.mxu1 %v1691_v43  ;;  %v195_v43 = vpack.c.bf16 %v1614_v57, %v1614_v57 }
  0x38   :  { %664 = vmatpush.bf16.msrb.mxu2 %v1698_v46  ;;  %v1734_v46 = vld [vmem:[%s1841_s2 + $0x100] sm:$0xff] }
  0x39   :  { %677 = vmatpush.bf16.msrb.mxu3 %v1703_v47  ;;  %v1739_v47 = vld [vmem:[%s1841_s2 + $0x140] sm:$0xff] }
  0x3a   :  { %639 = vmatpush.bf16.msrb.mxu0 %v1710_v48  ;;  %v1746_v48 = vld [vmem:[%s1841_s2 + $0x180] sm:$0xff] }
  0x3b   :  { %652 = vmatpush.bf16.msrb.mxu1 %v1715_v49  ;;  %v1751_v49 = vld [vmem:[%s1841_s2 + $0x1c0] sm:$0xff] }
  0x3c   :  { %665 = vmatpush.bf16.msrb.mxu2 %v1722_v56  ;;  %v193_v56 = vpack.c.bf16 %v177_v61, %v177_v61 }
  0x3d   :  { %678 = vmatpush.bf16.msrb.mxu3 %v1727_v62  ;;  %v196_v62 = vpack.c.bf16 %v1616_v58, %v1616_v58 }
  0x3e   :  { %640 = vmatpush.bf16.msrb.mxu0 %v1734_v46 }
  0x3f   :  { %653 = vmatpush.bf16.msrb.mxu1 %v1739_v47 }
  0x40   :  { %666 = vmatpush.bf16.msrb.mxu2 %v1746_v48 }
  0x41   :  { %679 = vmatpush.bf16.msrb.mxu3 %v1751_v49  ;;  %641 = vmatmul.bf16.vlgmr.msrb.gmra.mxu0 %v193_v56 }
  0x42   :  { %724 = vmatpush.bf16.msra.mxu0 %v1348_v0  ;;  %654 = vmatmul.bf16.vlgmr.msrb.gmra.mxu1 %v194_v42  ;;  %v702_v0 = vld.sshfl [vmem:[#allocation1 + $0x10] sm:$0xff pattern:$0x75316420] }
  0x43   :  { %737 = vmatpush.bf16.msra.mxu1 %v1353_v1  ;;  %667 = vmatmul.bf16.vlgmr.msrb.gmra.mxu2 %v195_v43  ;;  %v700_v1 = vld.sshfl [vmem:[#allocation1] sm:$0xff pattern:$0x75316420] }
  0x44   :  { %750 = vmatpush.bf16.msra.mxu2 %v1358_v2  ;;  %680 = vmatmul.bf16.vlgmr.msrb.gmra.mxu3 %v196_v62  ;;  %v703_v2 = vld.sshfl [vmem:[#allocation1 + $0x18] sm:$0xff pattern:$0x75316420] }
  0x45   :  { %763 = vmatpush.bf16.msra.mxu3 %v1363_v3  ;;  %v701_v3 = vld.sshfl [vmem:[#allocation1 + $0x8] sm:$0xff pattern:$0x75316420] }
  0x46   :  { %725 = vmatpush.bf16.msra.mxu0 %v1370_v4  ;;  %v718_v4 = vpack.c.bf16 %v702_v0, %v702_v0 }
  0x47   :  { %738 = vmatpush.bf16.msra.mxu1 %v1375_v5  ;;  %v716_v5 = vpack.c.bf16 %v700_v1, %v700_v1 }
  0x48   :  { %751 = vmatpush.bf16.msra.mxu2 %v1382_v6  ;;  %v719_v6 = vpack.c.bf16 %v703_v2, %v703_v2 }
  0x49   :  { %764 = vmatpush.bf16.msra.mxu3 %v1387_v7  ;;  %v717_v7 = vpack.c.bf16 %v701_v3, %v701_v3 }
  0x4a   :  { %726 = vmatpush.bf16.msra.mxu0 %v1394_v8  ;;  %v1860_v8 = vld [vmem:[#allocation7_spill] sm:$0xff] }
  0x4b   :  { %739 = vmatpush.bf16.msra.mxu1 %v1399_v9  ;;  %v1861_v9 = vld [vmem:[#allocation8_spill] sm:$0xff] }
  0x4c   :  { %752 = vmatpush.bf16.msra.mxu2 %v1406_v10  ;;  %v1862_v10 = vld [vmem:[#allocation9_spill] sm:$0xff] }
  0x4d   :  { %765 = vmatpush.bf16.msra.mxu3 %v1411_v11  ;;  %v1863_v11 = vld [vmem:[#allocation10_spill] sm:$0xff] }
  0x4e   :  { %727 = vmatpush.bf16.msra.mxu0 %v1418_v12  ;;  %v1864_v12 = vld [vmem:[#allocation11_spill] sm:$0xff] }
  0x4f   :  { %740 = vmatpush.bf16.msra.mxu1 %v1423_v13  ;;  %v1865_v13 = vld [vmem:[#allocation12_spill] sm:$0xff] }
  0x50   :  { %753 = vmatpush.bf16.msra.mxu2 %v1430_v14  ;;  %v704_v14 = vld.sshfl [vmem:[#allocation1 + $0x20] sm:$0xff pattern:$0x75316420] }
  0x51   :  { %766 = vmatpush.bf16.msra.mxu3 %v1435_v15  ;;  %v705_v15 = vld.sshfl [vmem:[#allocation1 + $0x28] sm:$0xff pattern:$0x75316420] }
  0x52   :  { %728 = vmatpush.bf16.msra.mxu0 %v1442_v16  ;;  %v1866_v16 = vld [vmem:[#allocation13_spill] sm:$0xff] }
  0x53   :  { %741 = vmatpush.bf16.msra.mxu1 %v1447_v17  ;;  %v1867_v17 = vld [vmem:[#allocation14_spill] sm:$0xff] }
  0x54   :  { %754 = vmatpush.bf16.msra.mxu2 %v1454_v18  ;;  %v706_v18 = vld.sshfl [vmem:[#allocation1 + $0x30] sm:$0xff pattern:$0x75316420] }
  0x55   :  { %767 = vmatpush.bf16.msra.mxu3 %v1459_v19  ;;  %v707_v19 = vld.sshfl [vmem:[#allocation1 + $0x38] sm:$0xff pattern:$0x75316420] }
  0x56   :  { %729 = vmatpush.bf16.msra.mxu0 %v1464_v20  ;;  %v720_v20 = vpack.c.bf16 %v704_v14, %v704_v14 }
  0x57   :  { %742 = vmatpush.bf16.msra.mxu1 %v1474_v22  ;;  %v721_v22 = vpack.c.bf16 %v705_v15, %v705_v15 }
  0x58   :  { %755 = vmatpush.bf16.msra.mxu2 %v1484_v24  ;;  %v722_v24 = vpack.c.bf16 %v706_v18, %v706_v18 }
  0x59   :  { %768 = vmatpush.bf16.msra.mxu3 %v1489_v25  ;;  %v723_v25 = vpack.c.bf16 %v707_v19, %v707_v19 }
  0x5a   :  { %730 = vmatpush.bf16.msra.mxu0 %v1496_v26 }
  0x5b   :  { %743 = vmatpush.bf16.msra.mxu1 %v1501_v27 }
  0x5c   :  { %756 = vmatpush.bf16.msra.mxu2 %v1508_v28 }
  0x5d   :  { %769 = vmatpush.bf16.msra.mxu3 %v1513_v29  ;;  %v1318_v29 = vmov 0.0  }
  0x5e   :  { %731 = vmatpush.bf16.msra.mxu0 %v1521_v31  ;;  %23 = vst.msk [vmem:[#allocation2] sm:$0xf] %vm22_vm0, %v1318_v29 }
  0x5f   :  { %744 = vmatpush.bf16.msra.mxu1 %v1526_v32  ;;  %24 = vst.msk [vmem:[#allocation3] sm:$0xf] %vm22_vm0, %v1318_v29 }
  0x60   :  { %757 = vmatpush.bf16.msra.mxu2 %v1536_v36 }
  0x61   :  { %770 = vmatpush.bf16.msra.mxu3 %v1541_v37  ;;  %732 = vmatmul.bf16.vlgmr.msra.gmra.mxu0 %v716_v5 }
  0x62   :  { %776 = vmatpush.bf16.msrb.mxu0 %v1546_v38  ;;  %745 = vmatmul.bf16.vlgmr.msra.gmra.mxu1 %v717_v7 }
  0x63   :  { %789 = vmatpush.bf16.msrb.mxu1 %v1553_v41  ;;  %758 = vmatmul.bf16.vlgmr.msra.gmra.mxu2 %v718_v4 }
  0x64   :  { %802 = vmatpush.bf16.msrb.mxu2 %v1564_v44  ;;  %771 = vmatmul.bf16.vlgmr.msra.gmra.mxu3 %v719_v6 }
  0x65   :  { %815 = vmatpush.bf16.msrb.mxu3 %v1569_v45  ;;  %v161_v58 = vld [vmem:[#allocation2] sm:$0xf] }
  0x66   :  { %777 = vmatpush.bf16.msrb.mxu0 %v1580_v50 }
  0x67   :  { %790 = vmatpush.bf16.msrb.mxu1 %v1585_v51 }
  0x68   :  { %803 = vmatpush.bf16.msrb.mxu2 %v1592_v52 }
  0x69   :  { %816 = vmatpush.bf16.msrb.mxu3 %v1597_v53 }
  0x6a   :  { %778 = vmatpush.bf16.msrb.mxu0 %v1602_v54 }
  0x6b   :  { %791 = vmatpush.bf16.msrb.mxu1 %v1607_v55 }
  0x6c   :  { %804 = vmatpush.bf16.msrb.mxu2 %v1623_v59 }
  0x6d   :  { %817 = vmatpush.bf16.msrb.mxu3 %v1628_v60 }
  0x6e   :  { %779 = vmatpush.bf16.msrb.mxu0 %v1638_v21 }
  0x6f   :  { %792 = vmatpush.bf16.msrb.mxu1 %v1643_v23 }
  0x70   :  { %805 = vmatpush.bf16.msrb.mxu2 %v1650_v30 }
  0x71   :  { %818 = vmatpush.bf16.msrb.mxu3 %v1655_v33  ;;  %v835_v33 = vld [vmem:[%s1842_s3] sm:$0xf] }
  0x72   :  { %780 = vmatpush.bf16.msrb.mxu0 %v1662_v34  ;;  %v836_v34 = vunpack.c.l.bf16 %v835_v33 }
  0x73   :  { %793 = vmatpush.bf16.msrb.mxu1 %v1667_v35 }
  0x74   :  { %806 = vmatpush.bf16.msrb.mxu2 %v1674_v39 }
  0x75   :  { %819 = vmatpush.bf16.msrb.mxu3 %v1679_v40 }
  0x76   :  { %781 = vmatpush.bf16.msrb.mxu0 %v1860_v8 }
  0x77   :  { %794 = vmatpush.bf16.msrb.mxu1 %v1861_v9  ;;  %v688_v9 = vld [vmem:[#allocation3] sm:$0xf] }
  0x78   :  { %807 = vmatpush.bf16.msrb.mxu2 %v1862_v10 }
  0x79   :  { %820 = vmatpush.bf16.msrb.mxu3 %v1863_v11 }
  0x7a   :  { %782 = vmatpush.bf16.msrb.mxu0 %v1864_v12 }
  0x7b   :  { %795 = vmatpush.bf16.msrb.mxu1 %v1865_v13 }
  0x7c   :  { %808 = vmatpush.bf16.msrb.mxu2 %v1866_v16 }
  0x7d   :  { %821 = vmatpush.bf16.msrb.mxu3 %v1867_v17 }
  0x7e   :  { %783 = vmatpush.bf16.msrb.mxu0 %v1734_v46 }
  0x7f   :  { %796 = vmatpush.bf16.msrb.mxu1 %v1739_v47 }
  0x80   :  { %809 = vmatpush.bf16.msrb.mxu2 %v1746_v48 }
  0x81   :  { %822 = vmatpush.bf16.msrb.mxu3 %v1751_v49  ;;  %784 = vmatmul.bf16.vlgmr.msrb.gmra.mxu0 %v720_v20 }
  0x82   :  { %797 = vmatmul.bf16.vlgmr.msrb.gmra.mxu1 %v721_v22 }
  0x83   :  { %810 = vmatmul.bf16.vlgmr.msrb.gmra.mxu2 %v722_v24 }
  0x84   :  { %823 = vmatmul.bf16.vlgmr.msrb.gmra.mxu3 %v723_v25 }
  0x9e   :  { %v590_v26 = vpop.f32.mrf.mxu0 }
  0x9f   :  { %v603_v27 = vpop.f32.mrf.mxu1 }
  0xa0   :  { %v604_v41 = vadd.f32 %v603_v27, %v590_v26 }
  0xa6   :  { %v616_v28 = vpop.f32.mrf.mxu2  ;;  %v592_v32 = vpop.f32.mrf.mxu0 }
  0xa7   :  { %v629_v31 = vpop.f32.mrf.mxu3  ;;  %v605_v36 = vpop.f32.mrf.mxu1  ;;  %v617_v44 = vadd.f32 %v616_v28, %v604_v41 }
  0xa9   :  { %v630_v45 = vadd.f32 %v629_v31, %v617_v44 }
  0xae   :  { %v618_v37 = vpop.f32.mrf.mxu2 }
  0xaf   :  { %v631_v38 = vpop.f32.mrf.mxu3 }
  0xbe   :  { %v642_v50 = vpop.f32.mrf.mxu0 }
  0xbf   :  { %v643_v51 = vadd.f32 %v642_v50, %v630_v45  ;;  %v655_v52 = vpop.f32.mrf.mxu1 }
  0xc1   :  { %v656_v53 = vadd.f32 %v655_v52, %v643_v51 }
  0xc6   :  { %v668_v54 = vpop.f32.mrf.mxu2  ;;  %v644_v59 = vpop.f32.mrf.mxu0 }
  0xc7   :  { %v669_v55 = vadd.f32 %v668_v54, %v656_v53  ;;  %v681_v57 = vpop.f32.mrf.mxu3  ;;  %v657_v61 = vpop.f32.mrf.mxu1 }
  0xc9   :  { %v682_v60 = vadd.f32 %v681_v57, %v669_v55 }
  0xcb   :  { %v685_v63 = vadd.f32 %v682_v60, %v161_v58 }
  0xcd   :  { %687 = vst.msk [vmem:[#allocation2] sm:$0xf] %vm22_vm0, %v685_v63 }
  0xce   :  { %v670_v21 = vpop.f32.mrf.mxu2 }
  0xcf   :  { %v683_v23 = vpop.f32.mrf.mxu3 }
  0xd4   :  { %v833_v30 = vld [vmem:[#allocation2] sm:$0xf] }
  0xd5   :  { %1226 = vmatpush.msk.msra.mxu0 %vm841_vm1, %v833_v30 }
  0xd6   :  { %1227 = vmatmul.msk.f32.vlgmr.msra.gmra.mxu0 %vm837_vm2, %v836_v34 }
  0xde   :  { %v733_v35 = vpop.f32.mrf.mxu0 }
  0xdf   :  { %v746_v39 = vpop.f32.mrf.mxu1 }
  0xe0   :  { %v747_v49 = vadd.f32 %v746_v39, %v733_v35 }
  0xe6   :  { %v759_v40 = vpop.f32.mrf.mxu2  ;;  %v735_v43 = vpop.f32.mrf.mxu0 }
  0xe7   :  { %v772_v42 = vpop.f32.mrf.mxu3  ;;  %v748_v46 = vpop.f32.mrf.mxu1  ;;  %v760_v56 = vadd.f32 %v759_v40, %v747_v49 }
  0xe9   :  { %v773_v62 = vadd.f32 %v772_v42, %v760_v56 }
  0xee   :  { %v761_v47 = vpop.f32.mrf.mxu2 }
  0xef   :  { %v774_v48 = vpop.f32.mrf.mxu3 }
  0xfe   :  { %v785_v0 = vpop.f32.mrf.mxu0 }
  0xff   :  { %v798_v1 = vpop.f32.mrf.mxu1  ;;  %v786_v2 = vadd.f32 %v785_v0, %v773_v62 }
 0x101   :  { %v799_v3 = vadd.f32 %v798_v1, %v786_v2 }
 0x106   :  { %v811_v4 = vpop.f32.mrf.mxu2  ;;  %v787_v7 = vpop.f32.mrf.mxu0 }
 0x107   :  { %v824_v5 = vpop.f32.mrf.mxu3  ;;  %v812_v6 = vadd.f32 %v811_v4, %v799_v3  ;;  %v800_v8 = vpop.f32.mrf.mxu1 }
 0x109   :  { %v825_v10 = vadd.f32 %v824_v5, %v812_v6 }
 0x10b   :  { %v828_v11 = vadd.f32 %v825_v10, %v688_v9 }
 0x10d   :  { %829 = vst.msk [vmem:[#allocation3] sm:$0xf] %vm22_vm0, %v828_v11 }
 0x10e   :  { %v813_v12 = vpop.f32.mrf.mxu2 }
 0x10f   :  { %v826_v13 = vpop.f32.mrf.mxu3 }
 0x114   :  { %v834_v14 = vld [vmem:[#allocation3] sm:$0xf] }
 0x115   :  { %1228 = vmatpush.msk.msra.mxu1 %vm841_vm1, %v834_v14 }
 0x116   :  { %1229 = vmatmul.msk.f32.vlgmr.msra.gmra.mxu1 %vm837_vm2, %v836_v34 }
 0x153   :  { %v862_v15 = vpop.f32.mrf.mxu0 }
 0x154   :  { %v906_v16 = vmul.f32 %v862_v15, %v862_v15 }
 0x156   :  { %v907_v17 = vsel %vm890_vm3, %v906_v16, 0.0 }
 0x157   :  { %908 = vadd.xlane.f32.xlu0 %v907_v17 }
 0x193   :  { %v885_v18 = vpop.f32.mrf.mxu1 }
 0x194   :  { %v910_v19 = vmul.f32 %v885_v18, %v885_v18  ;;  %v902_v20 = vmul.f32 %v885_v18, %v862_v15  ;;  %v888_v22 = vsub.f32 %v862_v15, %v885_v18 }
 0x196   :  { %v911_v24 = vsel %vm890_vm3, %v910_v19, 0.0  ;;  %v903_v25 = vsel %vm890_vm3, %v902_v20, 0.0  ;;  %v889_v26 = vmul.f32 %v888_v22, %v888_v22 }
 0x197   :  { %912 = vadd.xlane.f32.xlu0 %v911_v24  ;;  %904 = vadd.xlane.f32.xlu1 %v903_v25 }
 0x198   :  { %v891_v27 = vsel %vm890_vm3, %v889_v26, 0.0 }
 0x19f   :  { %892 = vadd.xlane.f32.xlu1 %v891_v27 }
 0x1ca   :  { %v909_v28 = vpop.xlane.xlu0 %908 }
 0x1cb   :  { %v914_v29 = vmax.f32 %v909_v28, 1e-08 }
 0x1cd   :  { %1300 = vrsqrt.f32 %v914_v29  ;;  %vm921_vm4 = vweird.f32 %v914_v29 }
 0x1d3   :  { %v1301_v31 = vpop.eup %1300 }
 0x1d4   :  { %v916_v32 = vmul.f32 %v1301_v31, %v914_v29  ;;  %vm922_vm5 = vweird.f32 %v1301_v31 }
 0x1d5   :  { %vm923_vm6 = vmor %vm921_vm4, %vm922_vm5 }
 0x1d6   :  { %v917_v41 = vmul.f32 %v1301_v31, %v916_v32 }
 0x1d8   :  { %v918_v44 = vmul.f32 0.5, %v917_v41 }
 0x1da   :  { %v919_v53 = vsub.f32 1.5, %v918_v44 }
 0x1dc   :  { %v920_v59 = vmul.f32 %v1301_v31, %v919_v53 }
 0x1de   :  { %v924_v21 = vsel %vm923_vm6, %v1301_v31, %v920_v59 }
 0x20a   :  { %v913_v36 = vpop.xlane.xlu0 %912  ;;  %v905_v37 = vpop.xlane.xlu1 %904 }
 0x20b   :  { %v926_v38 = vmax.f32 %v913_v36, 1e-08  ;;  %v925_v30 = vmul.f32 %v924_v21, %v905_v37 }
 0x20d   :  { %1302 = vrsqrt.f32 %v926_v38  ;;  %vm933_vm8 = vweird.f32 %v926_v38 }
 0x212   :  { %v893_v45 = vpop.xlane.xlu1 %892 }
 0x213   :  { %v1303_v50 = vpop.eup %1302  ;;  %v894_v51 = vrot.slane %v893_v45, 4 }
 0x214   :  { %v928_v52 = vmul.f32 %v1303_v50, %v926_v38  ;;  %vm934_vm7 = vweird.f32 %v1303_v50 }
 0x215   :  { %v895_v54 = vadd.f32 %v894_v51, %v893_v45  ;;  %vm935_vm9 = vmor %vm933_vm8, %vm934_vm7 }
 0x216   :  { %v929_v55 = vmul.f32 %v1303_v50, %v928_v52 }
 0x217   :  { %v896_v57 = vrot.slane %v895_v54, 2 }
 0x218   :  { %v930_v58 = vmul.f32 0.5, %v929_v55 }
 0x219   :  { %v897_v60 = vadd.f32 %v896_v57, %v895_v54 }
 0x21a   :  { %v931_v61 = vsub.f32 1.5, %v930_v58 }
 0x21b   :  { %v898_v63 = vrot.slane %v897_v60, 1 }
 0x21c   :  { %v932_v23 = vmul.f32 %v1303_v50, %v931_v61 }
 0x21d   :  { %v899_v33 = vadd.f32 %v898_v63, %v897_v60 }
 0x21e   :  { %v936_v34 = vsel %vm935_vm9, %v1303_v50, %v932_v23 }
 0x21f   :  { %1294 = vpush %v899_v33  ;;  %v937_v35 = vmul.f32 %v936_v34, %v925_v30 }
 0x221   :  { %v939_v39 = vsel %vm938_vm10, %v937_v35, 0.0 }
 0x222   :  { %940 = vadd.xlane.f32.xlu2 %v939_v39 }
 0x250   :  { %s1295_s3 = spop %1294 }
 0x251   :  { %s950_s28 = smul.f32 0.0052083335, %s1295_s3 }
 0x295   :  { %v941_v40 = vpop.xlane.xlu2 %940 }
 0x296   :  { %v942_v42 = vrot.slane %v941_v40, 4 }
 0x298   :  { %v943_v43 = vadd.f32 %v942_v42, %v941_v40 }
 0x29a   :  { %v944_v46 = vrot.slane %v943_v43, 2 }
 0x29c   :  { %v945_v47 = vadd.f32 %v944_v46, %v943_v43 }
 0x29e   :  { %v946_v48 = vrot.slane %v945_v47, 1 }
 0x2a0   :  { %v947_v49 = vadd.f32 %v946_v48, %v945_v47 }
 0x2a2   :  { %1296 = vpush %v947_v49 }
 0x2d3   :  { %s1297_s29 = spop %1296 }
 0x2d4   :  { %s951_s30 = smul.f32 0.16666667, %s1297_s29 }
 0x2d6   :  { %s952_s5 = ssub.f32 %s950_s28, %s951_s30 }
 0x2d8   :  { %954 = sst [smem:[#allocation4]] %s952_s5 }
 0x2d9   :  { %963 = dma.smem_to_hbm %s1319_s6, 16, %s961_s27, [#allocation5]  }
 0x2da   :  { %1316 = dma.done.wait [#allocation5], 16  }
 0x2db   :  { %1317 = vsyncadd [#allocation5], 4294967280 }
 0x2dc   :  { %968 = sfence }
 0x2dd   :  { %969 = vsyncpa [#allocation5], 1 }

</bundles_post_ra>
